<compile_context>
chip_gen: v7x
topology: tpu7x:2x2x1
jax: 0.10.0
libtpu: 0.0.40
codegen_flags: <defaults>
</compile_context>

<pallas_src>
import jax
import jax.numpy as jnp
from jax.experimental import pallas as pl
from jax.experimental.pallas import tpu as pltpu


def _round_up(v, m):
    return (v + m - 1) // m * m


def _cdiv(a, b):
    return (a + b - 1) // b


def _pad2(a, rows, cols):
    return jnp.pad(a, ((0, rows - a.shape[0]), (0, cols - a.shape[1])))


# --------------------------------------------------------------------------
# Stage 1: per-node messages  m = relu(relu(x @ We1) @ We2) @ Wc
# Grid: (num_node_tiles,) -- each node row tile computed exactly once.
# All operands arrive in bf16; accumulation is f32 on the MXU.
# --------------------------------------------------------------------------
def _message_kernel(x_ref, we1_ref, we2_ref, wc_ref, m_ref):
    f32 = jnp.float32
    h = jnp.maximum(jnp.dot(x_ref[...], we1_ref[...],
                            preferred_element_type=f32), 0.0)
    h = jnp.maximum(jnp.dot(h.astype(we2_ref.dtype), we2_ref[...],
                            preferred_element_type=f32), 0.0)
    # F.dropout(p=0.2) is identity at inference.
    m = jnp.dot(h.astype(wc_ref.dtype), wc_ref[...],
                preferred_element_type=f32)
    m_ref[...] = m.astype(m_ref.dtype)


# --------------------------------------------------------------------------
# Stage 2: y = relu((inc @ m) * inv_deg) ; out = relu(relu(y @ Wd1) @ Wd2)
# Grid: (num_target_tiles, num_node_tiles) -- node axis is the reduction.
# Accumulates directly into the f32 output block (resident across k).
# --------------------------------------------------------------------------
def _make_aggregate_kernel(tile_k, msgs_resident):
    def kernel(inc_ref, m_ref, inv_deg_ref, wd1_ref, wd2_ref, out_ref):
        f32 = jnp.float32
        k = pl.program_id(1)

        @pl.when(k == 0)
        def _():
            out_ref[...] = jnp.zeros_like(out_ref)

        if msgs_resident:
            # Full message matrix lives in VMEM; slice the current K chunk.
            start = pl.multiple_of(k * tile_k, tile_k)
            m = m_ref[pl.ds(start, tile_k), :]
        else:
            m = m_ref[...]

        out_ref[...] += jnp.dot(inc_ref[...], m, preferred_element_type=f32)

        @pl.when(k == pl.num_programs(1) - 1)
        def _():
            # aggregation norm (precomputed reciprocal) + relu update,
            # then the decoder MLP on bf16 MXU operands.
            y = jnp.maximum(out_ref[...] * inv_deg_ref[...], 0.0)
            y = y.astype(wd1_ref.dtype)
            d = jnp.maximum(jnp.dot(y, wd1_ref[...],
                                    preferred_element_type=f32), 0.0)
            d = jnp.maximum(jnp.dot(d.astype(wd2_ref.dtype), wd2_ref[...],
                                    preferred_element_type=f32), 0.0)
            out_ref[...] = d

    return kernel


def allset_block(x, incidence, we1, we2, wc, wd1, wd2, *,
                 tile_t=512, tile_n=512,
                 compute_dtype=jnp.bfloat16,
                 msg_dtype=jnp.bfloat16, inc_dtype=jnp.bfloat16,
                 resident_msgs_bytes=8 * 1024 * 1024,
                 vmem_limit_bytes=48 * 1024 * 1024):
    """AllSetBlock forward (inference) via two pipelined Pallas kernels."""
    f32 = jnp.float32
    N, Cin = x.shape
    T = incidence.shape[0]
    H = wc.shape[1]

    Hp = _round_up(H, 128)            # lane-dense hidden dim

    # Tile clamping: tile_t multiple of 16 (bf16 sublane packing on the
    # incidence rows), tile_n multiple of 128 (lane dim of the inc tile).
    tile_t = min(tile_t, _round_up(T, 16))
    tile_t = _round_up(tile_t, 16)
    tile_n = min(tile_n, _round_up(N, 128))
    tile_n = _round_up(tile_n, 128)

    # Keep >=2 tiles on the parallel axes when the problem is big enough
    # (v7x megacore: 2 TensorCores share the "parallel" grid axes).
    if T >= 2 * 16 and _round_up(T, tile_t) // tile_t < 2:
        tile_t = _round_up(_cdiv(T, 2), 16)
    if N >= 2 * 128 and _round_up(N, tile_n) // tile_n < 2:
        tile_n = _round_up(_cdiv(N, 2), 128)

    Np = _round_up(N, tile_n)
    Tp = _round_up(T, tile_t)
    num_k = Np // tile_n

    # Zero-padding is exact: bias-free MLPs map zero rows to zero messages and
    # zero incidence rows/cols contribute nothing.
    # x keeps its true feature dim (full-dim last block is legal) in bf16.
    x_p = _pad2(x.astype(compute_dtype), Np, Cin)
    we1_p = _pad2(we1.astype(compute_dtype), Cin, Hp)
    we2_p = _pad2(we2.astype(compute_dtype), Hp, Hp)
    wc_p = _pad2(wc.astype(compute_dtype), Hp, Hp)
    wd1_p = _pad2(wd1.astype(compute_dtype), Hp, Hp)
    wd2_p = _pad2(wd2.astype(compute_dtype), Hp, Hp)

    # Hoisted aggregation norm from the *unpadded* incidence (f32, exact);
    # guard against empty rows, then pad the tiny reciprocal vector.
    deg = jnp.sum(incidence.astype(f32), axis=1, keepdims=True)        # (T, 1)
    inv_deg = jnp.where(deg > 0, 1.0 / deg, 0.0).astype(f32)
    inv_deg_p = jnp.pad(inv_deg, ((0, Tp - T), (0, 0)))                # (Tp, 1)

    # 0/1 incidence is exact in bf16; cast BEFORE padding so the big padded
    # f32 incidence is never materialized.
    inc_lp = _pad2(incidence.astype(inc_dtype), Tp, Np)

    # ---------------- stage 1: node messages ----------------
    msgs = pl.pallas_call(
        _message_kernel,
        out_shape=jax.ShapeDtypeStruct((Np, Hp), msg_dtype),
        grid_spec=pltpu.PrefetchScalarGridSpec(
            num_scalar_prefetch=0,
            grid=(Np // tile_n,),
            in_specs=[
                pl.BlockSpec((tile_n, Cin), lambda i: (i, 0)),
                pl.BlockSpec((Cin, Hp), lambda i: (0, 0)),     # resident weights
                pl.BlockSpec((Hp, Hp), lambda i: (0, 0)),
                pl.BlockSpec((Hp, Hp), lambda i: (0, 0)),
            ],
            out_specs=pl.BlockSpec((tile_n, Hp), lambda i: (i, 0)),
        ),
        compiler_params=pltpu.CompilerParams(
            dimension_semantics=("parallel",),
            vmem_limit_bytes=vmem_limit_bytes,
        ),
    )(x_p, we1_p, we2_p, wc_p)

    # ---------------- stage 2: aggregate + decode ----------------
    msg_bytes = Np * Hp * jnp.dtype(msg_dtype).itemsize
    msgs_resident = msg_bytes <= resident_msgs_bytes
    if msgs_resident:
        # Whole message matrix VMEM-resident; no re-streaming across i-tiles.
        m_spec = pl.BlockSpec((Np, Hp), lambda i, k: (0, 0))
    else:
        m_spec = pl.BlockSpec((tile_n, Hp), lambda i, k: (k, 0))

    out_p = pl.pallas_call(
        _make_aggregate_kernel(tile_n, msgs_resident),
        out_shape=jax.ShapeDtypeStruct((Tp, Hp), f32),
        grid_spec=pltpu.PrefetchScalarGridSpec(
            num_scalar_prefetch=0,
            grid=(Tp // tile_t, num_k),
            in_specs=[
                pl.BlockSpec((tile_t, tile_n), lambda i, k: (i, k)),
                m_spec,
                pl.BlockSpec((tile_t, 1), lambda i, k: (i, 0)),
                pl.BlockSpec((Hp, Hp), lambda i, k: (0, 0)),   # resident weights
                pl.BlockSpec((Hp, Hp), lambda i, k: (0, 0)),
            ],
            out_specs=pl.BlockSpec((tile_t, Hp), lambda i, k: (i, 0)),
        ),
        compiler_params=pltpu.CompilerParams(
            dimension_semantics=("parallel", "arbitrary"),
            vmem_limit_bytes=vmem_limit_bytes,
        ),
    )(inc_lp, msgs, inv_deg_p, wd1_p, wd2_p)

    return out_p[:T, :H]


def _xavier(key, fan_in, fan_out):
    bound = (6.0 / (fan_in + fan_out)) ** 0.5
    return jax.random.uniform(key, (fan_in, fan_out), jnp.float32, -bound, bound)


def reference(x, inc, we1, we2, wc, wd1, wd2):
    h = jnp.maximum(jnp.maximum(x @ we1, 0.0) @ we2, 0.0)
    m = h @ wc
    y = jnp.maximum((inc @ m) / jnp.sum(inc, axis=1, keepdims=True), 0.0)
    return jnp.maximum(jnp.maximum(y @ wd1, 0.0) @ wd2, 0.0)


if __name__ == "__main__":
    in_channels = 16
    hidden_channels = 32
    num_nodes = 200      # columns of incidence (nodes)
    num_edges = 24       # rows of incidence (hyperedges / output rows)

    key = jax.random.PRNGKey(0)
    kx, kinc, k1, k2, k3, k4, k5 = jax.random.split(key, 7)

    x = jax.random.normal(kx, (num_nodes, in_channels), jnp.float32)
    # Dense 0/1 incidence; ensure every row has at least one nonzero.
    inc = (jax.random.uniform(kinc, (num_edges, num_nodes)) < 0.1).astype(jnp.float32)
    inc = inc.at[:, 0].set(1.0)

    # nn.Linear(bias=False) / Conv weights stored (in_features, out_features).
    we1 = _xavier(k1, in_channels, hidden_channels)
    we2 = _xavier(k2, hidden_channels, hidden_channels)
    wc = _xavier(k3, hidden_channels, hidden_channels)
    wd1 = _xavier(k4, hidden_channels, hidden_channels)
    wd2 = _xavier(k5, hidden_channels, hidden_channels)

    ref = reference(x, inc, we1, we2, wc, wd1, wd2)

    # 1) Small tiles -> multi-step grids in both stages, resident-msgs path
    #    with in-kernel K slicing and the output-resident accumulator.
    out_a = allset_block(x, inc, we1, we2, wc, wd1, wd2, tile_t=16, tile_n=128)
    out_a = jax.block_until_ready(out_a)
    assert out_a.shape == (num_edges, hidden_channels)
    assert jnp.allclose(out_a, ref, atol=5e-2, rtol=5e-2), \
        float(jnp.max(jnp.abs(out_a - ref)))

    # 2) Same tiles, but force the streamed-msgs (non-resident) path.
    out_b = allset_block(x, inc, we1, we2, wc, wd1, wd2, tile_t=16, tile_n=128,
                         resident_msgs_bytes=0)
    out_b = jax.block_until_ready(out_b)
    assert jnp.allclose(out_b, ref, atol=5e-2, rtol=5e-2), \
        float(jnp.max(jnp.abs(out_b - ref)))

    # 3) Default (production-sized) tiles, exercising the clamping logic.
    out_c = allset_block(x, inc, we1, we2, wc, wd1, wd2)
    out_c = jax.block_until_ready(out_c)
    assert jnp.allclose(out_c, ref, atol=5e-2, rtol=5e-2), \
        float(jnp.max(jnp.abs(out_c - ref)))

    print("KERNEL_OK")
</pallas_src>

<mosaic_0001>
module attributes {stable_mosaic.version = 11 : i64} {
  func.func @_message_kernel(%arg0: i32, %arg1: memref<128x16xbf16, #tpu.memory_space<vmem>>, %arg2: memref<16x128xbf16, #tpu.memory_space<vmem>>, %arg3: memref<128x128xbf16, #tpu.memory_space<vmem>>, %arg4: memref<128x128xbf16, #tpu.memory_space<vmem>>, %arg5: memref<128x128xbf16, #tpu.memory_space<vmem>>) attributes {dimension_semantics = [#tpu.dimension_semantics<parallel>], iteration_bounds = array<i64: 2>, scalar_prefetch = 0 : i64, scratch_operands = 0 : i64, tpu.core_type = #tpu.core_type<tc>, window_params = [{transform_indices = @transform_0, window_bounds = array<i64: 128, 16>}, {pipeline_mode = #tpu.pipeline_mode<synchronous>, transform_indices = @transform_1, window_bounds = array<i64: 16, 128>}, {pipeline_mode = #tpu.pipeline_mode<synchronous>, transform_indices = @transform_2, window_bounds = array<i64: 128, 128>}, {pipeline_mode = #tpu.pipeline_mode<synchronous>, transform_indices = @transform_3, window_bounds = array<i64: 128, 128>}, {transform_indices = @transform_4, window_bounds = array<i64: 128, 128>}]} {
    %c0 = arith.constant 0 : index
    %c0_0 = arith.constant 0 : index
    %0 = vector.load %arg1[%c0, %c0_0] : memref<128x16xbf16, #tpu.memory_space<vmem>>, vector<128x16xbf16>
    %c0_1 = arith.constant 0 : index
    %c0_2 = arith.constant 0 : index
    %1 = vector.load %arg2[%c0_1, %c0_2] : memref<16x128xbf16, #tpu.memory_space<vmem>>, vector<16x128xbf16>
    %cst = arith.constant dense<0.000000e+00> : vector<128x128xf32>
    %2 = tpu.matmul %0, %1, %cst {dimension_numbers = #tpu.dot_dimension_numbers<[1], [0], [0], [1], [0, 0, 1, 1], [], []>} : vector<128x16xbf16>, vector<16x128xbf16>, vector<128x128xf32> -> vector<128x128xf32>
    %cst_3 = arith.constant 0.000000e+00 : f32
    %3 = vector.broadcast %cst_3 : f32 to vector<128x128xf32>
    %4 = arith.maximumf %2, %3 : vector<128x128xf32>
    %5 = arith.truncf %4 : vector<128x128xf32> to vector<128x128xbf16>
    %c0_4 = arith.constant 0 : index
    %c0_5 = arith.constant 0 : index
    %6 = vector.load %arg3[%c0_4, %c0_5] : memref<128x128xbf16, #tpu.memory_space<vmem>>, vector<128x128xbf16>
    %cst_6 = arith.constant dense<0.000000e+00> : vector<128x128xf32>
    %7 = tpu.matmul %5, %6, %cst_6 {dimension_numbers = #tpu.dot_dimension_numbers<[1], [0], [0], [1], [0, 0, 1, 1], [], []>} : vector<128x128xbf16>, vector<128x128xbf16>, vector<128x128xf32> -> vector<128x128xf32>
    %cst_7 = arith.constant 0.000000e+00 : f32
    %8 = vector.broadcast %cst_7 : f32 to vector<128x128xf32>
    %9 = arith.maximumf %7, %8 : vector<128x128xf32>
    %10 = arith.truncf %9 : vector<128x128xf32> to vector<128x128xbf16>
    %c0_8 = arith.constant 0 : index
    %c0_9 = arith.constant 0 : index
    %11 = vector.load %arg4[%c0_8, %c0_9] : memref<128x128xbf16, #tpu.memory_space<vmem>>, vector<128x128xbf16>
    %cst_10 = arith.constant dense<0.000000e+00> : vector<128x128xf32>
    %12 = tpu.matmul %10, %11, %cst_10 {dimension_numbers = #tpu.dot_dimension_numbers<[1], [0], [0], [1], [0, 0, 1, 1], [], []>} : vector<128x128xbf16>, vector<128x128xbf16>, vector<128x128xf32> -> vector<128x128xf32>
    %13 = arith.truncf %12 : vector<128x128xf32> to vector<128x128xbf16>
    %c0_11 = arith.constant 0 : index
    %c0_12 = arith.constant 0 : index
    %14 = vector.load %arg5[%c0_11, %c0_12] : memref<128x128xbf16, #tpu.memory_space<vmem>>, vector<128x128xbf16>
    tpu.vector_store %arg5[%c0_11, %c0_12], %13 {strides = array<i32>} : memref<128x128xbf16, #tpu.memory_space<vmem>>, vector<128x128xbf16>,
    return
  }
  func.func @transform_0(%arg0: i32) -> (i32, i32) {
    %c0_i32 = arith.constant 0 : i32
    %c0_i32_0 = arith.constant 0 : i32
    return %arg0, %c0_i32 : i32, i32
  }
  func.func @transform_1(%arg0: i32) -> (i32, i32) {
    %c0_i32 = arith.constant 0 : i32
    %c0_i32_0 = arith.constant 0 : i32
    %c0_i32_1 = arith.constant 0 : i32
    return %c0_i32, %c0_i32_0 : i32, i32
  }
  func.func @transform_2(%arg0: i32) -> (i32, i32) {
    %c0_i32 = arith.constant 0 : i32
    %c0_i32_0 = arith.constant 0 : i32
    %c0_i32_1 = arith.constant 0 : i32
    return %c0_i32, %c0_i32_0 : i32, i32
  }
  func.func @transform_3(%arg0: i32) -> (i32, i32) {
    %c0_i32 = arith.constant 0 : i32
    %c0_i32_0 = arith.constant 0 : i32
    %c0_i32_1 = arith.constant 0 : i32
    return %c0_i32, %c0_i32_0 : i32, i32
  }
  func.func @transform_4(%arg0: i32) -> (i32, i32) {
    %c0_i32 = arith.constant 0 : i32
    %c0_i32_0 = arith.constant 0 : i32
    return %arg0, %c0_i32 : i32, i32
  }
}

</mosaic_0001>

<bundles_post_ra>
// kernel: tpu_custom_call.1
= control target key start
LH: loop header
LB: loop body
LE: loop exit
PB: predicated region body
PF: predicated region fallthrough
CT: control target
= control target key end

     0   :  { %9 = vsyncpa [#allocation3], 0  ;;  %s1483_s0 = inlined_call_operand.vmem [shape: bf16[256,16], index: 0, kind: input, shape index: {}]   ;;  %s1484_s1 = inlined_call_operand.vmem [shape: bf16[16,128], index: 1, kind: input, shape index: {}]   ;;  %s1485_s2 = inlined_call_operand.vmem [shape: bf16[128,128], index: 2, kind: input, shape index: {}]   ;;  %s1486_s3 = inlined_call_operand.vmem [shape: bf16[128,128], index: 3, kind: input, shape index: {}]   ;;  %s1487_s4 = inlined_call_operand.hbm [shape: bf16[256,128], index: 4, kind: output, shape index: {}]  }
   0x1   :  { %11 = vsyncpa [#allocation3 + $0x1], 0  ;;  %s1318_s15 = smov 0   ;;  %s1320_s16 = smov 0  }
   0x2   :  { %s1322_s17 = smov 0   ;;  %s1324_s18 = smov 0  }
   0x3 LB: > { %s1339_s19 = sadd.s32 4294967295, %s1288_s18   ;;  %s912_s20 = sadd.s32 4294967294, %s1288_s18   ;;  %s1288_s18 = sphi %s1324_s18, %s1493_s18   ;;  %s1284_s17 = sphi %s1322_s17, %s1492_s17   ;;  %s1280_s16 = sphi %s1320_s16, %s1491_s16   ;;  %s1276_s15 = sphi %s1318_s15, %s1490_s15  }
   0x4   : > { %s1343_s21 = sadd.s32 1, %s1288_s18   ;;  %s113_s22 = sadd.s32 1, %s1284_s17 }
   0x5   : > { %s110_s23 = ssub.s32 %s1288_s18, %s1343_s21  ;;  %p123_p0 = scmp.ne.s32.totalorder %s1284_s17, %s1280_s16 }
   0x6   : > { %p111_p1 = scmp.eq.s32.totalorder %s110_s23, 0  ;;  %p124_p2 = scmp.eq.s32.totalorder %s1339_s19, 1 }
   0x7   : > { %p129_p3 = scmp.ne.s32.totalorder %s1280_s16, %s1276_s15  ;;  %p130_p4 = scmp.eq.s32.totalorder %s912_s20, 1 }
   0x8   : > { %s1354_s24 = scalar_select %p111_p1, %s1284_s17, %s113_s22  }
   0x9   : > { %p1356_p5 = por %p124_p2, %p123_p0  ;;  %p1360_p6 = por %p130_p4, %p129_p3 }
   0xa   : > { %p915_p7 = scmp.ge.s32.totalorder %s1288_s18, 1  ;;  %p166_p8 = scmp.lt.s32.totalorder %s1288_s18, 3 }
   0xc   : > { %p167_p9 = pnand %p915_p7, %p166_p8 }
   0xd   : > { %v1201_v0 = vld [vmem:[%s1484_s1] sm:$0xff] (!%p167_p9)   ;;  %s917_s29 = sshll.u32 (!%p167_p9), %s1339_s19, 4  ;;  %v1211_v2 = vld [vmem:[%s1485_s2 + $0x8] sm:$0xff] (!%p167_p9)   ;;  %vm264_vm0 = vcmask (!%p167_p9), 130048   ;;  %v1212_v3 = vld [vmem:[%s1485_s2 + $0x10] sm:$0xff] (!%p167_p9)   ;;  %s189_s6 = sand.u32 (!%p167_p9), 1, %s1280_s16  }
   0xe   : > { %170 = sbr.rel (%p167_p9) target bundleno = 722 (0x2d2), region = 36  ;;  %p193_p10 = scmp.lt.s32.totalorder (!%p167_p9), %s917_s29, 31  ;;  %1078 = vmatprep.subr.bf16.mxu0 (!%p167_p9), %v1201_v0  ;;  %v1210_v1 = vld [vmem:[%s1485_s2] sm:$0xff] (!%p167_p9)   ;;  %v1213_v7 = vld [vmem:[%s1485_s2 + $0x18] sm:$0xff] (!%p167_p9)   ;;  %v1215_v11 = vld [vmem:[%s1485_s2 + $0x28] sm:$0xff] (!%p167_p9)  }
   0xf   : > { %1079 = vmatpush3.bf16.msra.mxu0 (!%p167_p9), %v1201_v0  ;;  %1096 = vmatprep.subr.bf16.mxu1 (!%p167_p9), %v1210_v1  ;;  %v1214_v8 = vld [vmem:[%s1485_s2 + $0x20] sm:$0xff] (!%p167_p9)   ;;  %v1216_v15 = vld [vmem:[%s1485_s2 + $0x30] sm:$0xff] (!%p167_p9)   ;;  %v1217_v16 = vld [vmem:[%s1485_s2 + $0x38] sm:$0xff] (!%p167_p9)   ;;  %s916_s7 = sshll.u32 (!%p167_p9), %s189_s6, 6  ;;  %s989_s9 = sshll.u32 (!%p167_p9), %s1339_s19, 10 }
  0x10   : > { %1097 = vmatpush3.bf16.msra.mxu1 (!%p167_p9), %v1210_v1  ;;  %v1218_v17 = vld [vmem:[%s1486_s3] sm:$0xff] (!%p167_p9)   ;;  %v1219_v18 = vld [vmem:[%s1486_s3 + $0x8] sm:$0xff] (!%p167_p9)   ;;  %v1220_v19 = vld [vmem:[%s1486_s3 + $0x10] sm:$0xff] (!%p167_p9)   ;;  %s1436_s13 = scalar_lea.hbm (!%p167_p9), %s1487_s4, %s989_s9  ;;  %s1442_s19 = scalar_lea.sflag (!%p167_p9), [#allocation3], %s189_s6 }
  0x11   : > { %1098 = vmatprep.subr.bf16.mxu1 (!%p167_p9), %v1211_v2  ;;  %1128 = vmatprep.subr.bf16.mxu0 (!%p167_p9), %v1218_v17  ;;  %v1221_v20 = vld [vmem:[%s1486_s3 + $0x18] sm:$0xff] (!%p167_p9)   ;;  %v1222_v21 = vld [vmem:[%s1486_s3 + $0x20] sm:$0xff] (!%p167_p9)   ;;  %v1223_v22 = vld [vmem:[%s1486_s3 + $0x28] sm:$0xff] (!%p167_p9)   ;;  %s1290_s20 = smov (!%p167_p9), [#allocation2]  }
  0x12   : > { %v1224_v63 = vld [vmem:[%s1486_s3 + $0x30] sm:$0xff] (!%p167_p9)   ;;  %v1225_v0 = vld [vmem:[%s1486_s3 + $0x38] sm:$0xff] (!%p167_p9)   ;;  %s1230_s22 = sshll.u32 (!%p167_p9), %s1290_s20, 4  ;;  %s1231_s22 = int_to_ptr.vmem [resolvable:$false] %s1230_s22 }
  0x13   : > { %s1232_s23 = scalar_lea.vmem (!%p167_p9), %s1231_s22, 2048 }
  0x14   : > { %1099 = vmatpush3.bf16.msra.mxu1 (!%p167_p9), %v1211_v2 }
  0x15   : > { %s1495_s29 = smov (!%p193_p10, %s917_s29), 31  ;;  %1100 = vmatprep.subr.bf16.mxu1 %v1212_v3 }
  0x16   : > { %s918_s8 = sshll.u32 %s1495_s29, 2 }
  0x17   : > { %s196_s11 = scalar_lea.vmem %s1483_s0, %s918_s8  ;;  %s191_s8 = scalar_lea.vmem [#allocation2], %s916_s7 }
  0x18   : > { %v1202_v4 = vld [vmem:[%s196_s11] sm:$0xff]   ;;  %v1203_v5 = vld [vmem:[%s196_s11 + $0x8] sm:$0xff]   ;;  %v1204_v6 = vld [vmem:[%s196_s11 + $0x10] sm:$0xff]   ;;  %1101 = vmatpush3.bf16.msra.mxu1 %v1212_v3  ;;  %s850_s10 = sshll.u32 %s191_s8, 4  ;;  %s1438_s10 = int_to_ptr.vmem [resolvable:$true] %s850_s10 }
  0x19   : > { %1080 = vmatprep.mubr.msk.bf16.mxu0 %vm264_vm0, %v1202_v4  ;;  %v1205_v9 = vld [vmem:[%s196_s11 + $0x18] sm:$0xff]   ;;  %1102 = vmatprep.subr.bf16.mxu1 %v1213_v7  ;;  %v1206_v10 = vld [vmem:[%s196_s11 + $0x20] sm:$0xff]   ;;  %v1207_v12 = vld [vmem:[%s196_s11 + $0x28] sm:$0xff]   ;;  %s1226_s14 = scalar_lea.vmem %s1438_s10, 1024  ;;  %p1233_p0 = scmp.lt.s32.totalorder %s1438_s10, %s1231_s22 }
  0x1a   : > { %1081 = vmatmul.mubr.msk.bf16.vlgmr.msra.gmra.mrb[0].mxu0 %vm264_vm0, %v1203_v5  ;;  %v1208_v13 = vld [vmem:[%s196_s11 + $0x30] sm:$0xff]   ;;  %v1209_v14 = vld [vmem:[%s196_s11 + $0x38] sm:$0xff]   ;;  %p1227_p11 = scmp.ne.s32.totalorder %s1438_s10, %s1226_s14  ;;  %p1234_p1 = scmp.lt.s32.totalorder %s1232_s23, %s1226_s14 }
  0x1b   : > { %1084 = vmatprep.mubr.msk.bf16.mxu0 %vm264_vm0, %v1204_v6  ;;  %1129 = vmatpush3.bf16.msra.mxu0 %v1218_v17 }
  0x1c   : > { %1103 = vmatpush3.bf16.msra.mxu1 %v1213_v7  ;;  %1130 = vmatprep.subr.bf16.mxu0 %v1219_v18  ;;  %p1228_p12 = pnand %p1227_p11, %p1356_p5  ;;  %p1235_p2 = por %p1234_p1, %p1233_p0 }
  0x1d   : > { %1104 = vmatprep.subr.bf16.mxu1 %v1214_v8 }
  0x1e   : > { %p1229_p13 = pneg %p1228_p12 }
  0x1f   : > { %1131 = vmatpush3.bf16.msra.mxu0 %v1219_v18 }
  0x20   : > { %1105 = vmatpush3.bf16.msra.mxu1 %v1214_v8  ;;  %1132 = vmatprep.subr.bf16.mxu0 %v1220_v19  ;;  %p1236_p3 = pnand %p1235_p2, %p1229_p13 }
  0x21   : > { %1106 = vmatprep.subr.bf16.mxu1 %v1215_v11 }
  0x22   : > { %1085 = vmatmul.mubr.msk.bf16.gmra.mrb[4].mxu0 %vm264_vm0, %v1205_v9 }
  0x23   : > { %1088 = vmatprep.mubr.msk.bf16.mxu0 %vm264_vm0, %v1206_v10  ;;  %1133 = vmatpush3.bf16.msra.mxu0 %v1220_v19 }
  0x24   : > { %1107 = vmatpush3.bf16.msra.mxu1 %v1215_v11  ;;  %1134 = vmatprep.subr.bf16.mxu0 %v1221_v20 }
  0x25   : > { %1108 = vmatprep.subr.bf16.mxu1 %v1216_v15 }
  0x27   : > { %1135 = vmatpush3.bf16.msra.mxu0 %v1221_v20 }
  0x28   : > { %1109 = vmatpush3.bf16.msra.mxu1 %v1216_v15  ;;  %1136 = vmatprep.subr.bf16.mxu0 %v1222_v21 }
  0x29   : > { %1110 = vmatprep.subr.bf16.mxu1 %v1217_v16 }
  0x2a   : > { %1089 = vmatmul.mubr.msk.bf16.gmra.mrb[8].mxu0 %vm264_vm0, %v1207_v12 }
  0x2b   : > { %1092 = vmatprep.mubr.msk.bf16.mxu0 %vm264_vm0, %v1208_v13  ;;  %1137 = vmatpush3.bf16.msra.mxu0 %v1222_v21 }
  0x2c   : > { %1111 = vmatpush3.bf16.msra.mxu1 %v1217_v16  ;;  %1138 = vmatprep.subr.bf16.mxu0 %v1223_v22 }
  0x2f   : > { %1139 = vmatpush3.bf16.msra.mxu0 %v1223_v22 }
  0x30   : > { %1140 = vmatprep.subr.bf16.mxu0 %v1224_v63 }
  0x32   : > { %1093 = vmatmul.mubr.msk.bf16.gmra.mrb[12].mxu0 %vm264_vm0, %v1209_v14 }
  0x33   : > { %1141 = vmatpush3.bf16.msra.mxu0 %v1224_v63 }
  0x34   : > { %1142 = vmatprep.subr.bf16.mxu0 %v1225_v0 }
  0x37   : > { %1143 = vmatpush3.bf16.msra.mxu0 %v1225_v0 }
  0xed   : > { %v1082_v23 = vpop.f32.mrb[0].mxu0 }
  0xee   : > { %v323_v24 = vpop.f32.mrb[1].mxu0  ;;  %v388_v26 = vmax.f32 %v1082_v23, 0.0 }
  0xef   : > { %v1083_v25 = vpop.f32.mrb[2].mxu0  ;;  %v386_v29 = vmax.f32 %v323_v24, 0.0 }
  0xf0   : > { %v389_v27 = vmax.f32 %v1083_v25, 0.0  ;;  %v326_v28 = vpop.f32.mrb[3].mxu0 }
  0xf1   : > { %v387_v30 = vmax.f32 %v326_v28, 0.0 }
  0xf2   : > { %v403_v31 = vpack.c.bf16 %v389_v27, %v388_v26 }
  0xf3   : > { %v402_v32 = vpack.c.bf16 %v387_v30, %v386_v29 }
  0xf5   : > { %v1086_v33 = vpop.f32.mrb[4].mxu0  ;;  %1112 = vmatprep.mubr.bf16.mxu1 %v402_v32 }
  0xf6   : > { %v339_v34 = vpop.f32.mrb[5].mxu0  ;;  %1113 = vmatmul.mubr.bf16.vlgmr.msra.gmra.mrb[0].mxu1 %v403_v31  ;;  %v392_v36 = vmax.f32 %v1086_v33, 0.0 }
  0xf7   : > { %v1087_v35 = vpop.f32.mrb[6].mxu0  ;;  %v390_v39 = vmax.f32 %v339_v34, 0.0 }
  0xf8   : > { %v393_v37 = vmax.f32 %v1087_v35, 0.0  ;;  %v342_v38 = vpop.f32.mrb[7].mxu0 }
  0xf9   : > { %v391_v40 = vmax.f32 %v342_v38, 0.0 }
  0xfa   : > { %v405_v41 = vpack.c.bf16 %v393_v37, %v392_v36 }
  0xfb   : > { %v404_v42 = vpack.c.bf16 %v391_v40, %v390_v39 }
  0xfd   : > { %v1090_v43 = vpop.f32.mrb[8].mxu0  ;;  %1116 = vmatprep.mubr.bf16.mxu1 %v404_v42 }
  0xfe   : > { %v355_v44 = vpop.f32.mrb[9].mxu0  ;;  %1117 = vmatmul.mubr.bf16.gmra.mrb[4].mxu1 %v405_v41  ;;  %v396_v46 = vmax.f32 %v1090_v43, 0.0 }
  0xff   : > { %v1091_v45 = vpop.f32.mrb[10].mxu0  ;;  %v394_v49 = vmax.f32 %v355_v44, 0.0 }
 0x100   : > { %v397_v47 = vmax.f32 %v1091_v45, 0.0  ;;  %v358_v48 = vpop.f32.mrb[11].mxu0 }
 0x101   : > { %v395_v50 = vmax.f32 %v358_v48, 0.0 }
 0x102   : > { %v407_v51 = vpack.c.bf16 %v397_v47, %v396_v46 }
 0x103   : > { %v406_v52 = vpack.c.bf16 %v395_v50, %v394_v49 }
 0x105   : > { %v1094_v53 = vpop.f32.mrb[12].mxu0  ;;  %1120 = vmatprep.mubr.bf16.mxu1 %v406_v52 }
 0x106   : > { %v371_v54 = vpop.f32.mrb[13].mxu0  ;;  %1121 = vmatmul.mubr.bf16.gmra.mrb[8].mxu1 %v407_v51  ;;  %v400_v56 = vmax.f32 %v1094_v53, 0.0 }
 0x107   : > { %v1095_v55 = vpop.f32.mrb[14].mxu0  ;;  %v398_v59 = vmax.f32 %v371_v54, 0.0 }
 0x108   : > { %v401_v57 = vmax.f32 %v1095_v55, 0.0  ;;  %v374_v58 = vpop.f32.mrb[15].mxu0 }
 0x109   : > { %v399_v60 = vmax.f32 %v374_v58, 0.0 }
 0x10a   : > { %v409_v61 = vpack.c.bf16 %v401_v57, %v400_v56 }
 0x10b   : > { %v408_v62 = vpack.c.bf16 %v399_v60, %v398_v59 }
 0x10d   : > { %1124 = vmatprep.mubr.bf16.mxu1 %v408_v62 }
 0x10e   : > { %1125 = vmatmul.mubr.bf16.gmra.mrb[12].mxu1 %v409_v61 }
 0x1c9   : > { %v1114_v1 = vpop.f32.mrb[0].mxu1 }
 0x1ca   : > { %v508_v2 = vpop.f32.mrb[1].mxu1  ;;  %v573_v4 = vmax.f32 %v1114_v1, 0.0 }
 0x1cb   : > { %v1115_v3 = vpop.f32.mrb[2].mxu1  ;;  %v571_v7 = vmax.f32 %v508_v2, 0.0 }
 0x1cc   : > { %v574_v5 = vmax.f32 %v1115_v3, 0.0  ;;  %v511_v6 = vpop.f32.mrb[3].mxu1 }
 0x1cd   : > { %v572_v8 = vmax.f32 %v511_v6, 0.0 }
 0x1ce   : > { %v588_v9 = vpack.c.bf16 %v574_v5, %v573_v4 }
 0x1cf   : > { %v587_v10 = vpack.c.bf16 %v572_v8, %v571_v7 }
 0x1d1   : > { %v1118_v11 = vpop.f32.mrb[4].mxu1  ;;  %1144 = vmatprep.mubr.bf16.mxu0 %v587_v10 }
 0x1d2   : > { %v524_v12 = vpop.f32.mrb[5].mxu1  ;;  %1145 = vmatmul.mubr.bf16.vlgmr.msra.gmra.mrb[16].mxu0 %v588_v9  ;;  %v577_v14 = vmax.f32 %v1118_v11, 0.0 }
 0x1d3   : > { %v1119_v13 = vpop.f32.mrb[6].mxu1  ;;  %v575_v17 = vmax.f32 %v524_v12, 0.0 }
 0x1d4   : > { %v578_v15 = vmax.f32 %v1119_v13, 0.0  ;;  %v527_v16 = vpop.f32.mrb[7].mxu1 }
 0x1d5   : > { %v576_v18 = vmax.f32 %v527_v16, 0.0 }
 0x1d6   : > { %v590_v19 = vpack.c.bf16 %v578_v15, %v577_v14 }
 0x1d7   : > { %v589_v20 = vpack.c.bf16 %v576_v18, %v575_v17 }
 0x1d9   : > { %v1122_v21 = vpop.f32.mrb[8].mxu1  ;;  %1148 = vmatprep.mubr.bf16.mxu0 %v589_v20 }
 0x1da   : > { %v540_v22 = vpop.f32.mrb[9].mxu1  ;;  %1149 = vmatmul.mubr.bf16.gmra.mrb[20].mxu0 %v590_v19  ;;  %v581_v24 = vmax.f32 %v1122_v21, 0.0 }
 0x1db   : > { %v1123_v23 = vpop.f32.mrb[10].mxu1  ;;  %v579_v27 = vmax.f32 %v540_v22, 0.0 }
 0x1dc   : > { %v582_v25 = vmax.f32 %v1123_v23, 0.0  ;;  %v543_v26 = vpop.f32.mrb[11].mxu1 }
 0x1dd   : > { %v580_v28 = vmax.f32 %v543_v26, 0.0 }
 0x1de   : > { %v592_v29 = vpack.c.bf16 %v582_v25, %v581_v24 }
 0x1df   : > { %v591_v30 = vpack.c.bf16 %v580_v28, %v579_v27 }
 0x1e1   : > { %v1126_v31 = vpop.f32.mrb[12].mxu1  ;;  %1152 = vmatprep.mubr.bf16.mxu0 %v591_v30 }
 0x1e2   : > { %v556_v32 = vpop.f32.mrb[13].mxu1  ;;  %1153 = vmatmul.mubr.bf16.gmra.mrb[24].mxu0 %v592_v29  ;;  %v585_v34 = vmax.f32 %v1126_v31, 0.0 }
 0x1e3   : > { %v1127_v33 = vpop.f32.mrb[14].mxu1  ;;  %v583_v37 = vmax.f32 %v556_v32, 0.0 }
 0x1e4   : > { %v586_v35 = vmax.f32 %v1127_v33, 0.0  ;;  %v559_v36 = vpop.f32.mrb[15].mxu1 }
 0x1e5   : > { %v584_v38 = vmax.f32 %v559_v36, 0.0 }
 0x1e6   : > { %v594_v39 = vpack.c.bf16 %v586_v35, %v585_v34 }
 0x1e7   : > { %v593_v40 = vpack.c.bf16 %v584_v38, %v583_v37 }
 0x1e9   : > { %1156 = vmatprep.mubr.bf16.mxu0 %v593_v40 }
 0x1ea   : > { %1157 = vmatmul.mubr.bf16.gmra.mrb[28].mxu0 %v594_v39 }
 0x2a5   : > { %v1146_v41 = vpop.f32.mrb[16].mxu0 }
 0x2a6   : > { %v693_v42 = vpop.f32.mrb[17].mxu0 }
 0x2a7   : > { %v1147_v43 = vpop.f32.mrb[18].mxu0 }
 0x2a8   : > { %v998_v44 = vpack.c.bf16 %v1147_v43, %v1146_v41  ;;  %v696_v45 = vpop.f32.mrb[19].mxu0 }
 0x2a9   : > { %v993_v46 = vpack.c.bf16 %v696_v45, %v693_v42 }
 0x2aa   : > { %1030 = vst [vmem:[%s191_s8 + $0x8] sm:$0xff] %v998_v44  }
 0x2ab   : > { %994 = vst [vmem:[%s191_s8] sm:$0xff] %v993_v46  }
 0x2ad   : > { %v1150_v47 = vpop.f32.mrb[20].mxu0 }
 0x2ae   : > { %v709_v48 = vpop.f32.mrb[21].mxu0 }
 0x2af   : > { %v1151_v49 = vpop.f32.mrb[22].mxu0 }
 0x2b0   : > { %v1008_v50 = vpack.c.bf16 %v1151_v49, %v1150_v47  ;;  %v712_v51 = vpop.f32.mrb[23].mxu0 }
 0x2b1   : > { %v1003_v52 = vpack.c.bf16 %v712_v51, %v709_v48 }
 0x2b2   : > { %1032 = vst [vmem:[%s191_s8 + $0x18] sm:$0xff] %v1008_v50  }
 0x2b3   : > { %1031 = vst [vmem:[%s191_s8 + $0x10] sm:$0xff] %v1003_v52  }
 0x2b5   : > { %v1154_v53 = vpop.f32.mrb[24].mxu0 }
 0x2b6   : > { %v725_v54 = vpop.f32.mrb[25].mxu0 }
 0x2b7   : > { %v1155_v55 = vpop.f32.mrb[26].mxu0 }
 0x2b8   : > { %v1018_v56 = vpack.c.bf16 %v1155_v55, %v1154_v53  ;;  %v728_v57 = vpop.f32.mrb[27].mxu0 }
 0x2b9   : > { %v1013_v58 = vpack.c.bf16 %v728_v57, %v725_v54 }
 0x2ba   : > { %1034 = vst [vmem:[%s191_s8 + $0x28] sm:$0xff] %v1018_v56  }
 0x2bb   : > { %1033 = vst [vmem:[%s191_s8 + $0x20] sm:$0xff] %v1013_v58  }
 0x2bd   : > { %v1158_v59 = vpop.f32.mrb[28].mxu0 }
 0x2be   : > { %v741_v60 = vpop.f32.mrb[29].mxu0 }
 0x2bf   : > { %v1159_v61 = vpop.f32.mrb[30].mxu0 }
 0x2c0   : > { %v1028_v62 = vpack.c.bf16 %v1159_v61, %v1158_v59  ;;  %v744_v63 = vpop.f32.mrb[31].mxu0 }
 0x2c1   : > { %v1023_v0 = vpack.c.bf16 %v744_v63, %v741_v60 }
 0x2c2   : > { %1036 = vst [vmem:[%s191_s8 + $0x38] sm:$0xff] %v1028_v62  }
 0x2c3   : > { %1035 = vst [vmem:[%s191_s8 + $0x30] sm:$0xff] %v1023_v0  }
 0x2c4   : > { %1239 = shalt.err (!%p1236_p3)
}
 0x2c5   : > { %s1240_s27 = scalar_lea.hbm %s1436_s13, 1024  ;;  %s1244_s30 = scalar_lea.hbm %s1487_s4, 2048 }
 0x2c6   : > { %p1241_p4 = scmp.ne.s32.totalorder %s1436_s13, %s1240_s27  ;;  %p1245_p9 = scmp.lt.u32.totalorder %s1436_s13, %s1487_s4 }
 0x2c7   : > { %p1246_p10 = scmp.lt.u32.totalorder %s1244_s30, %s1240_s27  ;;  %p1248_p12 = scmp.lt.u32.totalorder %s1240_s27, %s1436_s13 }
 0x2c8   : > { %p1242_p7 = pnand %p1241_p4, %p1356_p5 }
 0x2c9   : > { %p1247_p11 = por %p1246_p10, %p1245_p9 }
 0x2ca   : > { %p1243_p8 = pneg %p1242_p7 }
 0x2cb   : > { %p1249_p13 = por %p1248_p12, %p1247_p11 }
 0x2cd   : > { %p1250_p0 = pnand %p1249_p13, %p1243_p8 }
 0x2cf   : > { %1253 = shalt.err (!%p1250_p0)
}
 0x2d0   : > { %s1291_s7 = smov 64   ;;  %s1292_s8 = smov 4  }
 0x2d1   : > { %1160 = dma.vmem_to_hbm [thread:$0]  (%p1356_p5), %s1438_s10, 1024, %s1436_s13, %s1442_s19, %s1291_s7, %s1291_s7, %s1292_s8  }
 0x2d2 PF: > { %p1166_p1 = scmp.ge.s32.totalorder %s1288_s18, 2  ;;  %s865_s9 = sand.u32 1, %s1276_s15  }
 0x2d3   : > { %s866_s11 = scalar_lea.sflag [#allocation3], %s865_s9 }
 0x2d4   : > { %p1163_p2 = pnand %p1166_p1, %p1360_p6 }
 0x2d6   : > { %1271 = dma.done.wait (!%p1163_p2), %s866_s11, 1024  }
 0x2d7   : > { %1273 = vsyncadd (!%p1163_p2), %s866_s11, 4294966272  ;;  %p14_p3 = scmp.ge.s32.totalorder %s1343_s21, 4   ;;  %s1490_s15 = smov %s1280_s16 }
 0x2d8   : > { %s1491_s16 = smov %s1284_s17  ;;  %s1492_s17 = smov %s1354_s24 }
 0x2d9   : > { %s1493_s18 = smov %s1343_s21  ;;  %16 = sbr.rel (!%p14_p3) target bundleno = 3 (0x3), region = 71 }
 0x2e0   :  { %871 = vsyncpa [#allocation3], 1 }
 0x2e1   :  { %873 = vsyncpa [#allocation3 + $0x1], 1 }

</bundles_post_ra>
